<compile_context>
chip_gen: v5e
topology: v5e:2x2
jax: 0.10.0
libtpu: 0.0.40
codegen_flags: <defaults>
</compile_context>

<pallas_src>
import jax
import jax.numpy as jnp
from jax.experimental import pallas as pl
from jax.experimental.pallas import tpu as pltpu


# ----------------------------- helpers ---------------------------------------

def _round_up(x, m):
    return ((x + m - 1) // m) * m


def _divisors(n):
    return [d for d in range(1, n + 1) if n % d == 0]


def _sublane_multiple(dtype):
    # f32 -> 8 sublanes, bf16 -> 16, int8/fp8 -> 32.
    return max(8, 32 // jnp.dtype(dtype).itemsize)


def _device_vmem_and_cores():
    """Per-TensorCore VMEM capacity and TC count, with conservative fallbacks."""
    vmem_cap = 64 << 20          # conservative (v7x per-TC); v5e/v6e have 128 MiB
    num_tc = 1
    try:
        info = pltpu.get_tpu_info()
        cap = getattr(info, "vmem_capacity_bytes", None)
        if cap:
            vmem_cap = int(cap)
        for attr in ("num_tensorcores", "tensorcores_per_chip", "num_cores",
                     "core_count"):
            v = getattr(info, attr, None)
            if isinstance(v, int) and v > 0:
                num_tc = v
                break
    except Exception:
        pass
    return vmem_cap, num_tc


def _pick_fast_bt(B, C_pad, HWp, itemsize, budget, num_tc):
    """Largest batch-block (divisor of B) whose double-buffered in+out block
    fits `budget`; prefer step counts that are multiples of the TC count."""
    feas = []
    for d in _divisors(B):
        ws = 4 * d * C_pad * HWp * itemsize          # in + out, double-buffered
        if ws <= budget:
            feas.append(d)
    if not feas:
        return None
    balanced = [d for d in feas if (B // d) % num_tc == 0]
    return max(balanced) if balanced else max(feas)


def _pick_tiled_blocks(B, C_pad, HWp, itemsize, budget):
    """(batch block, HW chunk) for the two-pass path. Prefers wide lane-dense
    HW chunks; falls back to the minimum (1, 128) tile."""
    n128 = HWp // 128
    for g in sorted(_divisors(n128), reverse=True):
        hw_chunk = g * 128
        per_batch = (4 * C_pad * hw_chunk * itemsize        # x in + out, dbl-buf
                     + 2 * C_pad * 128 * 4                   # f32 pool partials
                     + 2 * C_pad * 128 * itemsize)           # gate
        max_bt = budget // per_batch
        if max_bt >= 1:
            bt = max(d for d in _divisors(B) if d <= max_bt)
            return bt, hw_chunk
    return 1, 128


# ----------------------------- kernels ---------------------------------------

def _make_fused_eca_kernel(inv_hw):
    def kernel(w_ref, x_ref, o_ref):
        # w_ref: (3,) f32 conv taps in SMEM.
        # x_ref / o_ref: (bt, C, HWp) tile; channels on sublanes, HW on lanes.
        C = x_ref.shape[1]
        # Global average pool over the lane axis (padded lanes are zero;
        # inv_hw uses the true H*W so the mean stays correct).
        pool = jnp.sum(x_ref[...], axis=-1, dtype=jnp.float32) * inv_hw   # (bt, C)
        # Conv1d over channels, k=3, zero pad 1, no bias (lane-axis roll).
        ch = jax.lax.broadcasted_iota(jnp.int32, pool.shape, 1)
        left = jnp.where(ch > 0, jnp.roll(pool, 1, axis=1), 0.0)          # pool[c-1]
        right = jnp.where(ch < C - 1, jnp.roll(pool, -1, axis=1), 0.0)    # pool[c+1]
        y = w_ref[0] * left + w_ref[1] * pool + w_ref[2] * right
        gate = jax.nn.sigmoid(y).astype(o_ref.dtype)[:, :, None]          # (bt, C, 1)
        # Re-read the tile at the store site (short live range, streams well).
        o_ref[...] = x_ref[...] * gate
    return kernel


def _pool_kernel(x_ref, psum_ref):
    # Accumulate partial spatial sums across the HW-chunk grid axis.
    @pl.when(pl.program_id(1) == 0)
    def _():
        psum_ref[...] = jnp.zeros_like(psum_ref)
    psum_ref[...] += jnp.sum(x_ref[...], axis=-1, keepdims=True,
                             dtype=jnp.float32)


def _rescale_kernel(gate_ref, x_ref, o_ref):
    o_ref[...] = x_ref[...] * gate_ref[...]


# ----------------------------- wrapper ----------------------------------------

def eca_forward(x, conv_w, *, vmem_budget_bytes=None):
    """x: (B, C, H, W); conv_w: (1, 1, 3) Conv1d weight (no bias)."""
    B, C, H, W = x.shape
    HW = H * W
    dtype = x.dtype
    itemsize = jnp.dtype(dtype).itemsize
    sub = _sublane_multiple(dtype)
    C_pad = _round_up(C, sub)                   # padded-dim aware VMEM accounting
    HWp = _round_up(HW, 128)                    # lane-dense spatial width
    inv_hw = 1.0 / float(HW)                    # true H*W, not the padded width

    vmem_cap, num_tc = _device_vmem_and_cores()
    if vmem_budget_bytes is None:
        vmem_budget_bytes = min(64 << 20, int(vmem_cap * 0.75))
    budget = max(int(vmem_budget_bytes), 16 * 1024)
    vmem_hard_cap = int(vmem_cap * 0.9)

    w = conv_w.reshape(-1).astype(jnp.float32)  # (3,)

    x3 = x.reshape(B, C, HW)
    if HWp != HW:
        x3 = jnp.pad(x3, ((0, 0), (0, 0), (0, HWp - HW)))

    bt = _pick_fast_bt(B, C_pad, HWp, itemsize, budget, num_tc)

    if bt is not None:
        # ---------- fast path: one fused pass over HBM ----------
        ws = 4 * bt * C_pad * HWp * itemsize
        vmem_limit = int(min(max(int(ws * 1.25) + (2 << 20), 4 << 20),
                             vmem_hard_cap))
        cost = pl.CostEstimate(
            flops=2 * B * C * HW + 6 * B * C,
            transcendentals=B * C,
            bytes_accessed=2 * B * C * HWp * itemsize,
        )
        out3 = pl.pallas_call(
            _make_fused_eca_kernel(inv_hw),
            out_shape=jax.ShapeDtypeStruct((B, C, HWp), dtype),
            grid=(B // bt,),
            in_specs=[
                pl.BlockSpec(memory_space=pltpu.MemorySpace.SMEM),     # conv taps
                pl.BlockSpec((bt, C, HWp), lambda b: (b, 0, 0)),       # x block
            ],
            out_specs=pl.BlockSpec((bt, C, HWp), lambda b: (b, 0, 0)),
            compiler_params=pltpu.CompilerParams(
                dimension_semantics=("parallel",),
                vmem_limit_bytes=vmem_limit,
            ),
            cost_estimate=cost,
        )(w, x3)
    else:
        # ---------- tiled fallback: pool pass + JAX gate + rescale pass ----------
        bt_t, hw_chunk = _pick_tiled_blocks(B, C_pad, HWp, itemsize, budget)
        n_h = HWp // hw_chunk
        ws = (4 * bt_t * C_pad * hw_chunk * itemsize
              + 2 * bt_t * C_pad * 128 * 4
              + 2 * bt_t * C_pad * 128 * itemsize)
        vmem_limit = int(min(max(int(ws * 1.25) + (2 << 20), 4 << 20),
                             vmem_hard_cap))

        psum = pl.pallas_call(
            _pool_kernel,
            out_shape=jax.ShapeDtypeStruct((B, C, 1), jnp.float32),
            grid=(B // bt_t, n_h),
            in_specs=[pl.BlockSpec((bt_t, C, hw_chunk), lambda b, h: (b, 0, h))],
            out_specs=pl.BlockSpec((bt_t, C, 1), lambda b, h: (b, 0, 0)),
            compiler_params=pltpu.CompilerParams(
                dimension_semantics=("parallel", "arbitrary"),
                vmem_limit_bytes=vmem_limit,
            ),
            cost_estimate=pl.CostEstimate(
                flops=B * C * HWp, transcendentals=0,
                bytes_accessed=B * C * HWp * itemsize + B * C * 4),
        )(x3)

        # Tiny (B, C) gate: 3-tap conv over channels + sigmoid in plain JAX.
        pool = psum[:, :, 0] * inv_hw
        p = jnp.pad(pool, ((0, 0), (1, 1)))
        y = w[0] * p[:, 0:C] + w[1] * p[:, 1:C + 1] + w[2] * p[:, 2:C + 2]
        gate = jax.nn.sigmoid(y).astype(dtype)[:, :, None]                # (B, C, 1)

        out3 = pl.pallas_call(
            _rescale_kernel,
            out_shape=jax.ShapeDtypeStruct((B, C, HWp), dtype),
            grid=(B // bt_t, n_h),
            in_specs=[
                pl.BlockSpec((bt_t, C, 1), lambda b, h: (b, 0, 0)),       # gate
                pl.BlockSpec((bt_t, C, hw_chunk), lambda b, h: (b, 0, h)),  # x
            ],
            out_specs=pl.BlockSpec((bt_t, C, hw_chunk), lambda b, h: (b, 0, h)),
            compiler_params=pltpu.CompilerParams(
                dimension_semantics=("parallel", "parallel"),
                vmem_limit_bytes=vmem_limit,
            ),
            cost_estimate=pl.CostEstimate(
                flops=B * C * HWp, transcendentals=0,
                bytes_accessed=2 * B * C * HWp * itemsize),
        )(gate, x3)

    if HWp != HW:
        out3 = out3[:, :, :HW]
    return out3.reshape(B, C, H, W)


def eca_reference(x, conv_w):
    """Pure-JAX reference mirroring the PyTorch forward."""
    xf = x.astype(jnp.float32)
    pool = jnp.mean(xf, axis=(2, 3))                       # (B, C)
    w = conv_w.reshape(-1).astype(jnp.float32)             # (3,)
    p = jnp.pad(pool, ((0, 0), (1, 1)))                    # (B, C+2)
    c = pool.shape[1]
    y = w[0] * p[:, 0:c] + w[1] * p[:, 1:c + 1] + w[2] * p[:, 2:c + 2]
    y = jax.nn.sigmoid(y)
    return (xf * y[:, :, None, None]).astype(x.dtype)


if __name__ == "__main__":
    key = jax.random.PRNGKey(0)
    kx, kw = jax.random.split(key)

    B, C, H, W = 2, 4, 16, 16
    x = jax.random.normal(kx, (B, C, H, W), dtype=jnp.float32)
    # Conv1d(1, 1, kernel_size=3, bias=False) weight: shape (1, 1, 3),
    # deterministic synthetic init.
    conv_w = (jax.random.uniform(kw, (1, 1, 3), dtype=jnp.float32) - 0.5) * (2.0 / 3.0 ** 0.5)

    ref = eca_reference(x, conv_w)

    # Fast path (whole batch block fits VMEM -> single fused pass).
    out = jax.block_until_ready(eca_forward(x, conv_w))
    assert out.shape == x.shape and out.dtype == x.dtype
    assert jnp.allclose(out, ref, atol=1e-5, rtol=1e-5)

    # Tiled fallback path (forced via a tiny VMEM budget) must match too.
    out_tiled = jax.block_until_ready(
        eca_forward(x, conv_w, vmem_budget_bytes=16 * 1024))
    assert out_tiled.shape == x.shape and out_tiled.dtype == x.dtype
    assert jnp.allclose(out_tiled, ref, atol=1e-5, rtol=1e-5)

    print("KERNEL_OK")
</pallas_src>

<mosaic_0001>
module attributes {stable_mosaic.version = 11 : i64} {
  func.func @kernel(%arg0: i32, %arg1: memref<3xf32, #tpu.memory_space<smem>>, %arg2: memref<2x4x256xf32, #tpu.memory_space<vmem>>, %arg3: memref<2x4x256xf32, #tpu.memory_space<vmem>>) attributes {dimension_semantics = [#tpu.dimension_semantics<parallel>], iteration_bounds = array<i64: 1>, scalar_prefetch = 0 : i64, scratch_operands = 0 : i64, tpu.core_type = #tpu.core_type<tc>, window_params = [{transform_indices = @transform_0, window_bounds = array<i64: 3>}, {transform_indices = @transform_1, window_bounds = array<i64: 2, 4, 256>}, {transform_indices = @transform_2, window_bounds = array<i64: 2, 4, 256>}]} {
    %c0 = arith.constant 0 : index
    %c0_0 = arith.constant 0 : index
    %c0_1 = arith.constant 0 : index
    %0 = vector.load %arg2[%c0, %c0_0, %c0_1] : memref<2x4x256xf32, #tpu.memory_space<vmem>>, vector<2x4x256xf32>
    %cst = arith.constant dense<0.000000e+00> : vector<2x4xf32>
    %1 = vector.multi_reduction <add>, %0, %cst [2] : vector<2x4x256xf32> to vector<2x4xf32>
    %cst_2 = arith.constant 3.906250e-03 : f32
    %2 = vector.broadcast %cst_2 : f32 to vector<2x4xf32>
    %3 = arith.mulf %1, %2 : vector<2x4xf32>
    %4 = tpu.iota {dimensions = array<i32: 1>} : vector<2x4xi32>
    %c0_i32 = arith.constant 0 : i32
    %5 = vector.broadcast %c0_i32 : i32 to vector<2x4xi32>
    %6 = arith.cmpi sgt, %4, %5 : vector<2x4xi32>
    %7 = vector.extract_strided_slice %3 {offsets = [0, 3], sizes = [2, 1], strides = [1, 1]} : vector<2x4xf32> to vector<2x1xf32>
    %8 = vector.extract_strided_slice %3 {offsets = [0, 0], sizes = [2, 3], strides = [1, 1]} : vector<2x4xf32> to vector<2x3xf32>
    %9 = tpu.concatenate %7, %8 in 1 : vector<2x1xf32>, vector<2x3xf32> -> vector<2x4xf32>
    %cst_3 = arith.constant 0.000000e+00 : f32
    %10 = vector.broadcast %cst_3 : f32 to vector<2x4xf32>
    %11 = arith.select %6, %9, %10 : vector<2x4xi1>, vector<2x4xf32>
    %c3_i32 = arith.constant 3 : i32
    %12 = vector.broadcast %c3_i32 : i32 to vector<2x4xi32>
    %13 = arith.cmpi slt, %4, %12 : vector<2x4xi32>
    %14 = vector.extract_strided_slice %3 {offsets = [0, 1], sizes = [2, 3], strides = [1, 1]} : vector<2x4xf32> to vector<2x3xf32>
    %15 = vector.extract_strided_slice %3 {offsets = [0, 0], sizes = [2, 1], strides = [1, 1]} : vector<2x4xf32> to vector<2x1xf32>
    %16 = tpu.concatenate %14, %15 in 1 : vector<2x3xf32>, vector<2x1xf32> -> vector<2x4xf32>
    %cst_4 = arith.constant 0.000000e+00 : f32
    %17 = vector.broadcast %cst_4 : f32 to vector<2x4xf32>
    %18 = arith.select %13, %16, %17 : vector<2x4xi1>, vector<2x4xf32>
    %c0_5 = arith.constant 0 : index
    %19 = memref.load %arg1[%c0_5] : memref<3xf32, #tpu.memory_space<smem>>
    %20 = vector.broadcast %19 : f32 to vector<2x4xf32>
    %21 = arith.mulf %20, %11 : vector<2x4xf32>
    %c1 = arith.constant 1 : index
    %22 = memref.load %arg1[%c1] : memref<3xf32, #tpu.memory_space<smem>>
    %23 = vector.broadcast %22 : f32 to vector<2x4xf32>
    %24 = arith.mulf %23, %3 : vector<2x4xf32>
    %25 = arith.addf %21, %24 : vector<2x4xf32>
    %c2 = arith.constant 2 : index
    %26 = memref.load %arg1[%c2] : memref<3xf32, #tpu.memory_space<smem>>
    %27 = vector.broadcast %26 : f32 to vector<2x4xf32>
    %28 = arith.mulf %27, %18 : vector<2x4xf32>
    %29 = arith.addf %25, %28 : vector<2x4xf32>
    %30 = arith.negf %29 : vector<2x4xf32>
    %31 = math.exp %30 : vector<2x4xf32>
    %cst_6 = arith.constant 1.000000e+00 : f32
    %32 = vector.broadcast %cst_6 : f32 to vector<2x4xf32>
    %33 = arith.addf %32, %31 : vector<2x4xf32>
    %34 = arith.divf %32, %33 : vector<2x4xf32>
    %35 = vector.shape_cast %34 : vector<2x4xf32> to vector<2x4x1xf32>
    %c0_7 = arith.constant 0 : index
    %c0_8 = arith.constant 0 : index
    %c0_9 = arith.constant 0 : index
    %36 = vector.load %arg2[%c0_7, %c0_8, %c0_9] : memref<2x4x256xf32, #tpu.memory_space<vmem>>, vector<2x4x256xf32>
    %37 = vector.broadcast %35 : vector<2x4x1xf32> to vector<2x4x256xf32>
    %38 = arith.mulf %36, %37 : vector<2x4x256xf32>
    %c0_10 = arith.constant 0 : index
    %c0_11 = arith.constant 0 : index
    %c0_12 = arith.constant 0 : index
    %39 = vector.load %arg3[%c0_10, %c0_11, %c0_12] : memref<2x4x256xf32, #tpu.memory_space<vmem>>, vector<2x4x256xf32>
    tpu.vector_store %arg3[%c0_10, %c0_11, %c0_12], %38 {strides = array<i32>} : memref<2x4x256xf32, #tpu.memory_space<vmem>>, vector<2x4x256xf32>,
    return
  }
  func.func @transform_0(%arg0: i32) -> i32 {
    %c0_i32 = arith.constant 0 : i32
    %c0_i32_0 = arith.constant 0 : i32
    return %c0_i32 : i32
  }
  func.func @transform_1(%arg0: i32) -> (i32, i32, i32) {
    %c0_i32 = arith.constant 0 : i32
    %c0_i32_0 = arith.constant 0 : i32
    %c0_i32_1 = arith.constant 0 : i32
    return %arg0, %c0_i32, %c0_i32_0 : i32, i32, i32
  }
  func.func @transform_2(%arg0: i32) -> (i32, i32, i32) {
    %c0_i32 = arith.constant 0 : i32
    %c0_i32_0 = arith.constant 0 : i32
    %c0_i32_1 = arith.constant 0 : i32
    return %arg0, %c0_i32, %c0_i32_0 : i32, i32, i32
  }
}

</mosaic_0001>

<bundles_post_ra>
// kernel: tpu_custom_call.1
= control target key start
LH: loop header
LB: loop body
LE: loop exit
PB: predicated region body
PF: predicated region fallthrough
CT: control target
= control target key end

     0   :  { %7 = vsyncpa [#allocation5], 0  ;;  %s328_s0 = inlined_call_operand.hbm [shape: f32[3], index: 0, kind: input, shape index: {}]   ;;  %s329_s1 = inlined_call_operand.hbm [shape: f32[2,4,256], index: 1, kind: input, shape index: {}]   ;;  %s330_s2 = inlined_call_operand.hbm [shape: f32[2,4,256], index: 2, kind: output, shape index: {}]  }
   0x1   :  { %8 = vsyncpa [#allocation3], 0 }
   0x2   :  { %9 = vsyncpa [#allocation4], 0  ;;  %s15_s11 = sshll.u32 %s328_s0, 4  ;;  %s23_s14 = sshll.u32 %s329_s1, 4  ;;  %s16_s11 = int_to_ptr.hbm [resolvable:$true] %s15_s11  ;;  %s24_s14 = int_to_ptr.hbm [resolvable:$true] %s23_s14 }
   0x3   :  { %s271_s15 = smov [#allocation2]   ;;  %s272_s16 = smov [#allocation6]  }
   0x4   :  { %18 = dma.hbm_to_smem %s16_s11, 16, %s271_s15, [#allocation5]  }
   0x5   :  { %s25_s17 = sshll.u32 %s272_s16, 4  ;;  %s273_s18 = smov 128   ;;  %s26_s17 = int_to_ptr.vmem [resolvable:$true] %s25_s17 }
   0x6   :  { %s274_s19 = smov 8  }
   0x7   :  { %31 = dma.hbm_to_vmem [thread:$0]  %s24_s14, 256, %s26_s17, [#allocation3], %s273_s18, %s273_s18, %s274_s19  }
   0x8   :  { %265 = dma.done.wait [#allocation5], 16  }
   0x9   :  { %266 = vsyncadd [#allocation5], 4294967280 }
   0xa   :  { %267 = dma.done.wait [#allocation3], 256  }
   0xb   :  { %268 = vsyncadd [#allocation3], 4294967040 }
   0xc   :  { %40 = sfence }
   0xd   :  { %v301_v0 = vld [vmem:[#allocation6] sm:$0xff]  ;;  %v303_v1 = vld [vmem:[#allocation6 + $0x8] sm:$0xff]  ;;  %vm56_vm0 = vcmask 1043456   ;;  %v69_v12 = vlaneseq  ;;  %s190_s0 = sld [smem:[#allocation2 + $0x1]]  ;;  %vm75_vm1 = vcmask 1044484   ;;  %vm90_vm2 = vcmask 1042434  }
   0xe   :  { %45 = vst [vmem:[#allocation1] ss:$2 sm:$0xff] %v301_v0  ;;  %s307_s1 = sld [smem:[#allocation2]]  ;;  %vm83_vm5 = vcmask 7168   ;;  %vm97_vm6 = vcmask 23552   ;;  %s276_s21 = smov [#allocation7]  }
   0xf   :  { %49 = vst [vmem:[#allocation1 + $0x10] ss:$2 sm:$0xff] %v303_v1  ;;  %v142_v13 = vshrl.u32 %v69_v12, 7  ;;  %v70_v15 = vand.u32 127, %v69_v12  ;;  %s309_s20 = sld [smem:[#allocation2 + $0x2]]  ;;  %s174_s22 = sshll.u32 %s276_s21, 4  ;;  %s175_s22 = int_to_ptr.vmem [resolvable:$true] %s174_s22 }
  0x10   :  { %s176_s25 = sshll.u32 %s330_s2, 4  ;;  %s177_s25 = int_to_ptr.hbm [resolvable:$true] %s176_s25 }
  0x11   :  { %199 = vset.pattern.permute.xlu1 %v142_v13  ;;  %200 = vset.pattern.permute.xlu0 %v142_v13  ;;  %v78_v17 = vadd.s32 4294967295, %v70_v15  ;;  %v87_v20 = vadd.s32 1, %v70_v15  ;;  %vm71_vm3 = vcmp.gt.s32.totalorder %v70_v15, 0  ;;  %vm86_vm4 = vcmp.lt.s32.totalorder %v70_v15, 3 }
  0x13   :  { %v104_v18 = vstv %s190_s0 }
  0x14   :  { %v101_v31 = vstv %s307_s1 }
  0x15   :  { %v46_v2 = vld.sshfl [vmem:[#allocation1] sm:$0xff pattern:$0x75316420]  ;;  %v47_v3 = vld.sshfl [vmem:[#allocation1 + $0x8] sm:$0xff pattern:$0x75316420]  ;;  %v115_v38 = vstv %s309_s20 }
  0x16   :  { %v57_v4 = vsel %vm56_vm0, %v46_v2, 0.0  ;;  %v58_v5 = vsel %vm56_vm0, %v47_v3, 0.0  ;;  %v50_v7 = vld.sshfl [vmem:[#allocation1 + $0x10] sm:$0xff pattern:$0x75316420] }
  0x17   :  { %v59_v6 = vadd.f32 %v58_v5, %v57_v4  ;;  %v51_v8 = vld.sshfl [vmem:[#allocation1 + $0x18] sm:$0xff pattern:$0x75316420]  ;;  %v62_v9 = vsel %vm56_vm0, %v50_v7, 0.0  ;;  %v275_v2 = vmov 839922192  }
  0x18   :  { %v63_v10 = vsel %vm56_vm0, %v51_v8, 0.0  ;;  %v157_v3 = vunpack.c.l.s4 %v275_v2 }
  0x19   :  { %60 = vadd.xlane.f32.xlu0 %v59_v6  ;;  %v64_v11 = vadd.f32 %v63_v10, %v62_v9 }
  0x1a   :  { %v158_v4 = vunpack.c.0.s8 %v157_v3 }
  0x21   :  { %65 = vadd.xlane.f32.xlu0 %v64_v11 }
  0x8c   :  { %v61_v14 = vpop.xlane.xlu0 %60 }
  0x8d   :  { %v67_v16 = vmul.f32 0.00390625, %v61_v14 }
  0x8f   :  { %v93_v22 = vrot.slane %v67_v16, 7  ;;  %v105_v23 = vmul.f32 %v104_v18, %v67_v16  ;;  %v79_v24 = vperm.slane %v67_v16, %v78_v17  ;;  %v88_v29 = vperm.slane %v67_v16, %v87_v20 }
  0x91   :  { %v109_v39 = vperm.slane %v105_v23, %v70_v15 }
  0x94   :  { %v66_v19 = vpop.xlane.xlu0 %65 }
  0x95   :  { %v68_v21 = vmul.f32 0.00390625, %v66_v19 }
  0x97   :  { %v74_v25 = vrot.slane %v68_v21, 7  ;;  %v94_v26 = vrot.slane %v68_v21, 6  ;;  %v106_v27 = vmul.f32 %v104_v18, %v68_v21  ;;  %v80_v28 = vperm.slane %v68_v21, %v78_v17 }
  0x98   :  { %v89_v30 = vperm.slane %v68_v21, %v87_v20 }
  0x99   :  { %v76_v32 = vsel %vm75_vm1, %v74_v25, %v67_v16  ;;  %v95_v33 = vsel %vm90_vm2, %v94_v26, %v93_v22  ;;  %v110_v34 = vperm.slane %v106_v27, %v70_v15  ;;  %v81_v35 = vsel %vm75_vm1, %v80_v28, %v79_v24 }
  0x9a   :  { %v84_v36 = vsel %vm83_vm5, %v76_v32, %v81_v35  ;;  %v91_v37 = vsel %vm90_vm2, %v89_v30, %v88_v29 }
  0x9b   :  { %v85_v40 = vsel %vm71_vm3, %v84_v36, 0.0  ;;  %v98_v41 = vsel %vm97_vm6, %v91_v37, %v95_v33  ;;  %v111_v44 = vsel %vm75_vm1, %v110_v34, %v109_v39 }
  0x9c   :  { %v99_v42 = vsel %vm86_vm4, %v98_v41, 0.0  ;;  %v102_v43 = vmul.f32 %v101_v31, %v85_v40 }
  0x9d   :  { %v116_v45 = vmul.f32 %v115_v38, %v99_v42 }
  0x9e   :  { %v113_v46 = vadd.f32 %v111_v44, %v102_v43 }
  0x9f   :  { %v118_v47 = vrot.slane %v116_v45, 6 }
  0xa1   :  { %v120_v48 = vadd.f32 %v118_v47, %v113_v46 }
  0xa3   :  { %v192_v49 = vmul.f32 -1.442695, %v120_v48 }
  0xa5   :  { %201 = vpow2.f32 %v192_v49 }
  0xab   :  { %v202_v50 = vpop.eup %201 }
  0xac   :  { %v124_v51 = vadd.f32 1.0, %v202_v50 }
  0xae   :  { %203 = vrcp.f32 %v124_v51  ;;  %v136_v55 = vand.u32 2147483648, %v124_v51  ;;  %v134_v57 = vand.u32 2147483647, %v124_v51  ;;  %vm130_vm8 = vweird.f32 %v124_v51 }
  0xb0   :  { %v137_v59 = vor.u32 1.1754944e-38, %v136_v55  ;;  %vm135_vm10 = vcmp.eq.f32.partialorder %v134_v57, 8.507059e+37 }
  0xb4   :  { %v204_v52 = vpop.eup %203 }
  0xb5   :  { %v126_v53 = vmul.f32 %v204_v52, %v124_v51  ;;  %vm131_vm7 = vweird.f32 %v204_v52 }
  0xb6   :  { %vm132_vm9 = vmor %vm130_vm8, %vm131_vm7 }
  0xb7   :  { %v127_v54 = vsub.f32 1.0, %v126_v53 }
  0xb9   :  { %v128_v56 = vmul.f32 %v204_v52, %v127_v54 }
  0xbb   :  { %v129_v58 = vadd.f32 %v204_v52, %v128_v56 }
  0xbd   :  { %v133_v60 = vsel %vm132_vm9, %v204_v52, %v129_v58 }
  0xbe   :  { %v138_v61 = vsel %vm135_vm10, %v137_v59, %v133_v60 }
  0xbf   :  { %v140_v62 = vperm.slane %v138_v61, 3  ;;  %v147_v63 = vperm.slane %v138_v61, 4 }
  0xc1   :  { %145 = vperm.xlu1 %199, %v140_v62  }
  0xc9   :  { %152 = vperm.xlu1 %199, %v147_v63  }
 0x133   :  { %v146_v5 = vpop.permute.xlu1 %145 }
 0x134   :  { %v159_v6 = vperm.slane %v146_v5, %v158_v4 }
 0x136   :  { %v166_v7 = vmul.f32 %v159_v6, %v301_v0 }
 0x138   :  { %168 = vst [vmem:[#allocation7] sm:$0xff] %v166_v7 }
 0x13b   :  { %v153_v8 = vpop.permute.xlu1 %152 }
 0x13c   :  { %v163_v9 = vperm.slane %v153_v8, %v158_v4 }
 0x13e   :  { %v167_v10 = vmul.f32 %v163_v9, %v303_v1 }
 0x140   :  { %169 = vst [vmem:[#allocation7 + $0x8] sm:$0xff] %v167_v10 }
 0x141   :  { %182 = dma.vmem_to_hbm [thread:$0]  %s175_s22, 256, %s177_s25, [#allocation4], %s273_s18, %s273_s18, %s274_s19  }
 0x142   :  { %269 = dma.done.wait [#allocation4], 256  }
 0x143   :  { %270 = vsyncadd [#allocation4], 4294967040 }
 0x144   :  { %187 = vsyncpa [#allocation3], 1 }
 0x145   :  { %188 = vsyncpa [#allocation4], 1 }
 0x146   :  { %189 = vsyncpa [#allocation5], 1 }

</bundles_post_ra>
